<compile_context>
chip_gen: v5e
topology: v5e:2x2
jax: 0.10.0
libtpu: 0.0.40
codegen_flags: <defaults>
</compile_context>

<pallas_src>
import functools

import jax
import jax.numpy as jnp
from jax import lax
from jax.experimental import pallas as pl
from jax.experimental.pallas import tpu as pltpu


# ----------------------- tiled linear: y = x @ w + b ------------------------

def _linear_kernel(x_ref, w_ref, b_ref, o_ref, acc_ref):
    @pl.when(pl.program_id(2) == 0)
    def _():
        acc_ref[...] = jnp.zeros_like(acc_ref)

    acc_ref[...] += jnp.dot(x_ref[...], w_ref[...],
                            preferred_element_type=jnp.float32)

    @pl.when(pl.program_id(2) == pl.num_programs(2) - 1)
    def _():
        o_ref[...] = (acc_ref[...] + b_ref[...].astype(jnp.float32)).astype(o_ref.dtype)


def _round_up(x, m):
    return (x + m - 1) // m * m


def _choose_tile(size, candidates):
    """Return (tile, padded_size).

    Small dims -> full-extent block (always legal).  Otherwise pick the largest
    exact-divisor candidate; if none divides, pad up to a multiple of the
    largest candidate (bounded block size, never a giant fallback block)."""
    cap = candidates[0]
    if size <= cap:
        return size, size
    for c in candidates:
        if size % c == 0:
            return c, size
    return cap, _round_up(size, cap)


def linear(x2d, w, b):
    """y = x2d @ w + b as a tiled (M, N, K) Pallas matmul with f32 accumulation."""
    M, K = x2d.shape
    Kw, N = w.shape
    assert K == Kw
    tm, Mp = _choose_tile(M, (1024, 512, 256, 128))   # rows: multiples of 8
    tn, Np = _choose_tile(N, (512, 384, 256, 128))    # lanes: multiples of 128
    tk, Kp = _choose_tile(K, (512, 384, 256, 128))

    if (Mp, Kp) != (M, K):
        x2d = jnp.pad(x2d, ((0, Mp - M), (0, Kp - K)))
    if (Kp, Np) != (K, N):
        w = jnp.pad(w, ((0, Kp - K), (0, Np - N)))
    b2d = b.reshape(1, N)
    if Np != N:
        b2d = jnp.pad(b2d, ((0, 0), (0, Np - N)))

    grid = (Mp // tm, Np // tn, Kp // tk)
    out = pl.pallas_call(
        _linear_kernel,
        out_shape=jax.ShapeDtypeStruct((Mp, Np), x2d.dtype),
        grid=grid,
        in_specs=[
            pl.BlockSpec((tm, tk), lambda i, j, k: (i, k)),
            pl.BlockSpec((tk, tn), lambda i, j, k: (k, j)),
            pl.BlockSpec((1, tn), lambda i, j, k: (0, j)),
        ],
        out_specs=pl.BlockSpec((tm, tn), lambda i, j, k: (i, j)),
        scratch_shapes=[pltpu.VMEM((tm, tn), jnp.float32)],
        compiler_params=pltpu.CompilerParams(
            dimension_semantics=("parallel", "parallel", "arbitrary")),
    )(x2d, w, b2d)
    if (Mp, Np) != (M, N):
        out = out[:M, :N]
    return out


# --------------------- attention core (head-group per step) -----------------

def _attn_kernel(a_ref, kc_ref, v_ref, o_ref, *, hp, hd):
    # a_ref / kc_ref : (1, hp, N, Ca)   with Ca = hd + kh + kw
    # v_ref          : (1, hp, N, hd)
    # o_ref          : (1, N, hp*hd)    (lane-dense block of the (B, N, dim) output)
    for j in range(hp):                       # hp is small (typically 1-2); static unroll
        a = a_ref[0, j]                       # (N, Ca), input dtype
        kc = kc_ref[0, j]                     # (N, Ca)
        v = v_ref[0, j]                       # (N, hd)

        # Fused scores: (q*scale) @ k^T  +  rel_h @ Eh  +  rel_w @ Ew
        # as a single deep MXU contraction; f32 accumulation.
        s = lax.dot_general(a, kc,
                            dimension_numbers=(((1,), (1,)), ((), ())),
                            preferred_element_type=jnp.float32)      # (N, N) f32

        # Numerically-stable softmax in f32 (reciprocal on the EUP).
        m = jnp.max(s, axis=-1, keepdims=True)
        p = jnp.exp(s - m)
        denom = jnp.sum(p, axis=-1, keepdims=True)

        o = lax.dot_general(p.astype(v.dtype), v,
                            dimension_numbers=(((1,), (0,)), ((), ())),
                            preferred_element_type=jnp.float32)      # (N, hd) f32
        o = o * pl.reciprocal(denom, approx=True)

        # Per-head store inside a lane-dense (multiple-of-128 or full-dim) output block;
        # the HBM writeback of the block is unmasked/lane-dense.
        o_ref[0, :, j * hd:(j + 1) * hd] = o.astype(o_ref.dtype)


def _heads_per_step(nh, hd):
    """Smallest head-group so the output block lane-width (hp*hd) is a multiple
    of 128 (dense HBM writeback); fall back to all heads (full-dim block)."""
    for hp in range(1, nh + 1):
        if nh % hp == 0 and (hp * hd) % 128 == 0:
            return hp
    return nh


def attention_core(a, kc, v, hp):
    # a, kc: (B, nh, N, Ca);  v: (B, nh, N, hd)  ->  (B, N, nh*hd)
    B, nh, N, Ca = a.shape
    hd = v.shape[-1]
    dim = nh * hd
    ng = nh // hp
    kernel = functools.partial(_attn_kernel, hp=hp, hd=hd)
    return pl.pallas_call(
        kernel,
        out_shape=jax.ShapeDtypeStruct((B, N, dim), v.dtype),
        grid=(B, ng),
        in_specs=[
            pl.BlockSpec((1, hp, N, Ca), lambda b, g: (b, g, 0, 0)),
            pl.BlockSpec((1, hp, N, Ca), lambda b, g: (b, g, 0, 0)),
            pl.BlockSpec((1, hp, N, hd), lambda b, g: (b, g, 0, 0)),
        ],
        out_specs=pl.BlockSpec((1, N, hp * hd), lambda b, g: (b, 0, g)),
        compiler_params=pltpu.CompilerParams(
            dimension_semantics=("parallel", "parallel")),
    )(a, kc, v)


# ------------------------- plain-JAX glue (rel-pos) -------------------------

def get_rel_pos(q_size, k_size, rel_pos):
    # rel_pos has shape (2*max(q,k)-1, C) here, so no interpolation branch is needed.
    max_rel_dist = int(2 * max(q_size, k_size) - 1)
    assert rel_pos.shape[0] == max_rel_dist
    q_coords = jnp.arange(q_size)[:, None] * max(k_size / q_size, 1.0)
    k_coords = jnp.arange(k_size)[None, :] * max(q_size / k_size, 1.0)
    rel_coords = (q_coords - k_coords + (k_size - 1) * max(q_size / k_size, 1.0)).astype(jnp.int32)
    return rel_pos[rel_coords]  # (q_size, k_size, C)


def get_decomposed_rel_pos_bias(q, rel_pos_h, rel_pos_w, q_size, k_size):
    # Reference-only helper (materializes the full (B*nh, N, N) bias).
    q_h, q_w = q_size
    k_h, k_w = k_size
    Rh = get_rel_pos(q_h, k_h, rel_pos_h)
    Rw = get_rel_pos(q_w, k_w, rel_pos_w)
    B, _, dim = q.shape
    r_q = q.reshape(B, q_h, q_w, dim)
    rel_h = jnp.einsum('bhwc,hkc->bhwk', r_q, Rh)
    rel_w = jnp.einsum('bhwc,wkc->bhwk', r_q, Rw)
    attn_bias = rel_h[:, :, :, :, None] + rel_w[:, :, :, None, :]
    return attn_bias.reshape(-1, q_h * q_w, k_h * k_w)


# ------------------------------ full forward --------------------------------

def sam_attention_forward(x, params, num_heads):
    # x: (B, H, W, dim)
    B, H, W, dim = x.shape
    N = H * W
    head_dim = dim // num_heads
    scale = head_dim ** -0.5
    dtype = x.dtype

    x2d = x.reshape(B * N, dim)
    qkv = linear(x2d, params["w_qkv"], params["b_qkv"])           # (B*N, 3*dim), Pallas
    qkv = qkv.reshape(B, N, 3, num_heads, head_dim)
    qkv = jnp.transpose(qkv, (2, 0, 3, 1, 4))                     # (3, B, nh, N, hd)
    q, k, v = qkv[0], qkv[1], qkv[2]

    # Decomposed rel-pos terms only — O(N*(kh+kw)) per head, never the (N, N) bias.
    Rh = get_rel_pos(H, H, params["rel_pos_h"])                   # (H, H, hd)
    Rw = get_rel_pos(W, W, params["rel_pos_w"])                   # (W, W, hd)
    r_q = q.reshape(B, num_heads, H, W, head_dim)
    rel_h = jnp.einsum('bnhwc,hkc->bnhwk', r_q, Rh).reshape(B, num_heads, N, H)
    rel_w = jnp.einsum('bnhwc,wkc->bnhwk', r_q, Rw).reshape(B, num_heads, N, W)

    # Tiny 0/1 column-expansion matrices (transposed), in the compute dtype:
    #   EhT[col, a] = 1 iff col // W == a,  EwT[col, b] = 1 iff col % W == b.
    cols = jnp.arange(N)
    ehT = (cols[:, None] // W == jnp.arange(H)[None, :]).astype(dtype)   # (N, H)
    ewT = (cols[:, None] % W == jnp.arange(W)[None, :]).astype(dtype)    # (N, W)
    ekt = jnp.concatenate([ehT, ewT], axis=-1)                           # (N, H+W)

    # Fused contraction operands (built once in XLA; consumed by the Pallas kernel).
    a = jnp.concatenate([(q * scale).astype(dtype),
                         rel_h.astype(dtype),
                         rel_w.astype(dtype)], axis=-1)                  # (B, nh, N, hd+H+W)
    kc = jnp.concatenate(
        [k, jnp.broadcast_to(ekt[None, None], (B, num_heads, N, H + W))],
        axis=-1)                                                         # (B, nh, N, hd+H+W)

    hp = _heads_per_step(num_heads, head_dim)
    attn_out = attention_core(a, kc, v, hp)                              # (B, N, dim), Pallas
    out = linear(attn_out.reshape(B * N, dim), params["w_proj"], params["b_proj"])
    return out.reshape(B, H, W, dim)


# ------------------------------ JAX reference --------------------------------

def sam_attention_reference(x, params, num_heads):
    B, H, W, dim = x.shape
    N = H * W
    head_dim = dim // num_heads
    scale = head_dim ** -0.5
    x2d = x.reshape(B * N, dim)
    qkv = x2d @ params["w_qkv"] + params["b_qkv"]
    qkv = qkv.reshape(B, N, 3, num_heads, head_dim)
    qkv = jnp.transpose(qkv, (2, 0, 3, 1, 4)).reshape(3, B * num_heads, N, head_dim)
    q, k, v = qkv[0], qkv[1], qkv[2]
    bias = get_decomposed_rel_pos_bias(q, params["rel_pos_h"], params["rel_pos_w"], (H, W), (H, W))
    attn = (q * scale) @ jnp.swapaxes(k, -2, -1) + bias
    attn = jax.nn.softmax(attn, axis=-1)
    out = attn @ v
    out = out.reshape(B, num_heads, N, head_dim)
    out = jnp.transpose(out, (0, 2, 1, 3)).reshape(B * N, dim)
    out = out @ params["w_proj"] + params["b_proj"]
    return out.reshape(B, H, W, dim)


# ---------------------------------- main -------------------------------------

if __name__ == "__main__":
    B, H, W = 2, 8, 8
    dim, num_heads = 32, 4
    head_dim = dim // num_heads

    key = jax.random.PRNGKey(0)
    kx, k1, k2, k3, k4, k5, k6 = jax.random.split(key, 7)

    x = jax.random.normal(kx, (B, H, W, dim), dtype=jnp.float32)

    # Deterministic synthetic parameters (module __init__ shapes).
    # Note: weights stored as (in, out); equivalent to PyTorch weight.T.
    params = {
        "w_qkv": 0.05 * jax.random.normal(k1, (dim, 3 * dim), dtype=jnp.float32),
        "b_qkv": 0.01 * jax.random.normal(k2, (3 * dim,), dtype=jnp.float32),
        "w_proj": 0.05 * jax.random.normal(k3, (dim, dim), dtype=jnp.float32),
        "b_proj": 0.01 * jax.random.normal(k4, (dim,), dtype=jnp.float32),
        # PyTorch inits these to zeros; random here to exercise the rel-pos path.
        "rel_pos_h": 0.02 * jax.random.normal(k5, (2 * H - 1, head_dim), dtype=jnp.float32),
        "rel_pos_w": 0.02 * jax.random.normal(k6, (2 * W - 1, head_dim), dtype=jnp.float32),
    }

    out = sam_attention_forward(x, params, num_heads)
    out = jax.block_until_ready(out)

    ref = sam_attention_reference(x, params, num_heads)
    assert out.shape == (B, H, W, dim)
    assert jnp.allclose(out, ref, rtol=2e-3, atol=2e-3), "Pallas output mismatch vs JAX reference"

    print("KERNEL_OK")
</pallas_src>

<mosaic_0001>
module attributes {stable_mosaic.version = 11 : i64} {
  func.func @_linear_kernel(%arg0: i32, %arg1: i32, %arg2: i32, %arg3: memref<128x32xf32, #tpu.memory_space<vmem>>, %arg4: memref<32x96xf32, #tpu.memory_space<vmem>>, %arg5: memref<1x96xf32, #tpu.memory_space<vmem>>, %arg6: memref<128x96xf32, #tpu.memory_space<vmem>>, %arg7: memref<128x96xf32, #tpu.memory_space<vmem>>) attributes {dimension_semantics = [#tpu.dimension_semantics<parallel>, #tpu.dimension_semantics<parallel>, #tpu.dimension_semantics<arbitrary>], iteration_bounds = array<i64: 1, 1, 1>, scalar_prefetch = 0 : i64, scratch_operands = 1 : i64, tpu.core_type = #tpu.core_type<tc>, window_params = [{transform_indices = @transform_0, window_bounds = array<i64: 128, 32>}, {transform_indices = @transform_1, window_bounds = array<i64: 32, 96>}, {transform_indices = @transform_2, window_bounds = array<i64: 1, 96>}, {transform_indices = @transform_3, window_bounds = array<i64: 128, 96>}]} {
    %c0_i32 = arith.constant 0 : i32
    %0 = arith.cmpi eq, %arg2, %c0_i32 : i32
    %1 = arith.extui %0 : i1 to i32
    %c0_i32_0 = arith.constant 0 : i32
    %2 = arith.cmpi ne, %1, %c0_i32_0 : i32
    scf.if %2 {
      %cst_10 = arith.constant 0.000000e+00 : f32
      %12 = vector.broadcast %cst_10 : f32 to vector<128x96xf32>
      %c0_11 = arith.constant 0 : index
      %c0_12 = arith.constant 0 : index
      %13 = vector.load %arg7[%c0_11, %c0_12] : memref<128x96xf32, #tpu.memory_space<vmem>>, vector<128x96xf32>
      tpu.vector_store %arg7[%c0_11, %c0_12], %12 {strides = array<i32>} : memref<128x96xf32, #tpu.memory_space<vmem>>, vector<128x96xf32>,
    } else {
    }
    %c0 = arith.constant 0 : index
    %c0_1 = arith.constant 0 : index
    %3 = vector.load %arg7[%c0, %c0_1] : memref<128x96xf32, #tpu.memory_space<vmem>>, vector<128x96xf32>
    %c0_2 = arith.constant 0 : index
    %c0_3 = arith.constant 0 : index
    %4 = vector.load %arg3[%c0_2, %c0_3] : memref<128x32xf32, #tpu.memory_space<vmem>>, vector<128x32xf32>
    %c0_4 = arith.constant 0 : index
    %c0_5 = arith.constant 0 : index
    %5 = vector.load %arg4[%c0_4, %c0_5] : memref<32x96xf32, #tpu.memory_space<vmem>>, vector<32x96xf32>
    %cst = arith.constant dense<0.000000e+00> : vector<128x96xf32>
    %6 = tpu.matmul %4, %5, %cst {dimension_numbers = #tpu.dot_dimension_numbers<[1], [0], [0], [1], [0, 0, 1, 1], [], []>} : vector<128x32xf32>, vector<32x96xf32>, vector<128x96xf32> -> vector<128x96xf32>
    %7 = arith.addf %3, %6 : vector<128x96xf32>
    %c0_6 = arith.constant 0 : index
    %c0_7 = arith.constant 0 : index
    %8 = vector.load %arg7[%c0_6, %c0_7] : memref<128x96xf32, #tpu.memory_space<vmem>>, vector<128x96xf32>
    tpu.vector_store %arg7[%c0_6, %c0_7], %7 {strides = array<i32>} : memref<128x96xf32, #tpu.memory_space<vmem>>, vector<128x96xf32>,
    %c0_i32_8 = arith.constant 0 : i32
    %9 = arith.cmpi eq, %arg2, %c0_i32_8 : i32
    %10 = arith.extui %9 : i1 to i32
    %c0_i32_9 = arith.constant 0 : i32
    %11 = arith.cmpi ne, %10, %c0_i32_9 : i32
    scf.if %11 {
      %c0_10 = arith.constant 0 : index
      %c0_11 = arith.constant 0 : index
      %12 = vector.load %arg7[%c0_10, %c0_11] : memref<128x96xf32, #tpu.memory_space<vmem>>, vector<128x96xf32>
      %c0_12 = arith.constant 0 : index
      %c0_13 = arith.constant 0 : index
      %13 = vector.load %arg5[%c0_12, %c0_13] : memref<1x96xf32, #tpu.memory_space<vmem>>, vector<1x96xf32>
      %14 = vector.broadcast %13 : vector<1x96xf32> to vector<128x96xf32>
      %15 = arith.addf %12, %14 : vector<128x96xf32>
      %c0_14 = arith.constant 0 : index
      %c0_15 = arith.constant 0 : index
      %16 = vector.load %arg6[%c0_14, %c0_15] : memref<128x96xf32, #tpu.memory_space<vmem>>, vector<128x96xf32>
      tpu.vector_store %arg6[%c0_14, %c0_15], %15 {strides = array<i32>} : memref<128x96xf32, #tpu.memory_space<vmem>>, vector<128x96xf32>,
    } else {
    }
    return
  }
  func.func @transform_0(%arg0: i32, %arg1: i32, %arg2: i32) -> (i32, i32) {
    %c0_i32 = arith.constant 0 : i32
    return %arg0, %arg2 : i32, i32
  }
  func.func @transform_1(%arg0: i32, %arg1: i32, %arg2: i32) -> (i32, i32) {
    %c0_i32 = arith.constant 0 : i32
    return %arg2, %arg1 : i32, i32
  }
  func.func @transform_2(%arg0: i32, %arg1: i32, %arg2: i32) -> (i32, i32) {
    %c0_i32 = arith.constant 0 : i32
    %c0_i32_0 = arith.constant 0 : i32
    return %c0_i32, %arg1 : i32, i32
  }
  func.func @transform_3(%arg0: i32, %arg1: i32, %arg2: i32) -> (i32, i32) {
    %c0_i32 = arith.constant 0 : i32
    return %arg0, %arg1 : i32, i32
  }
}

</mosaic_0001>

<bundles_post_ra>
// kernel: tpu_custom_call.1
= control target key start
LH: loop header
LB: loop body
LE: loop exit
PB: predicated region body
PF: predicated region fallthrough
CT: control target
= control target key end

     0   :  { %vm18_vm0 = vcmask 785408   ;;  %v307_v3 = vmov 0.0   ;;  %vm71_vm1 = vcmask 261120   ;;  %s521_s1 = inlined_call_operand.vmem [shape: f32[32,96], index: 1, kind: input, shape index: {}]   ;;  %s522_s0 = inlined_call_operand.vmem [shape: f32[128,32], index: 0, kind: input, shape index: {}]   ;;  %s523_s2 = inlined_call_operand.vmem [shape: f32[1,96], index: 2, kind: input, shape index: {}]   ;;  %s524_s3 = inlined_call_operand.vmem [shape: f32[128,96], index: 3, kind: output, shape index: {}]  }
   0x1   :  { %v70_v0 = vld [vmem:[%s521_s1 + $0x18] sm:$0xff]  ;;  %v69_v1 = vld [vmem:[%s521_s1 + $0x10] sm:$0xff]  ;;  %v68_v2 = vld [vmem:[%s521_s1 + $0x8] sm:$0xff]  ;;  %19 = vst.msk [vmem:[#allocation2] sm:$0xff] %vm18_vm0, %v307_v3 }
   0x2   :  { %294 = vmatpush.msra.mxu2 %v70_v0  ;;  %295 = vmatpush.msra.mxu3 %v70_v0  ;;  %v67_v4 = vld [vmem:[%s521_s1] sm:$0xff]  ;;  %20 = vst.msk [vmem:[#allocation2 + $0x8] sm:$0xff] %vm18_vm0, %v307_v3  ;;  %v60_v9 = vld [vmem:[%s522_s0 + $0x48] sm:$0xff]  ;;  %v61_v13 = vld [vmem:[%s522_s0 + $0x50] sm:$0xff] }
   0x3   :  { %132 = vmatpush.msra.mxu0 %v70_v0  ;;  %293 = vmatpush.msra.mxu1 %v70_v0  ;;  %v59_v5 = vld [vmem:[%s522_s0 + $0x40] sm:$0xff]  ;;  %21 = vst.msk [vmem:[#allocation2 + $0x10] sm:$0xff] %vm18_vm0, %v307_v3  ;;  %v64_v10 = vld [vmem:[%s522_s0 + $0x68] sm:$0xff]  ;;  %v65_v14 = vld [vmem:[%s522_s0 + $0x70] sm:$0xff] }
   0x4   :  { %297 = vmatpush.msra.mxu2 %v69_v1  ;;  %298 = vmatpush.msra.mxu3 %v69_v1  ;;  %v63_v6 = vld [vmem:[%s522_s0 + $0x60] sm:$0xff]  ;;  %22 = vst.msk [vmem:[#allocation2 + $0x18] sm:$0xff] %vm18_vm0, %v307_v3  ;;  %v52_v11 = vld [vmem:[%s522_s0 + $0x8] sm:$0xff]  ;;  %v53_v15 = vld [vmem:[%s522_s0 + $0x10] sm:$0xff] }
   0x5   :  { %133 = vmatpush.msra.mxu0 %v69_v1  ;;  %296 = vmatpush.msra.mxu1 %v69_v1  ;;  %v51_v7 = vld [vmem:[%s522_s0] sm:$0xff]  ;;  %23 = vst.msk [vmem:[#allocation2 + $0x20] sm:$0xff] %vm18_vm0, %v307_v3  ;;  %v56_v12 = vld [vmem:[%s522_s0 + $0x28] sm:$0xff]  ;;  %v57_v16 = vld [vmem:[%s522_s0 + $0x30] sm:$0xff] }
   0x6   :  { %300 = vmatpush.msra.mxu2 %v68_v2  ;;  %301 = vmatpush.msra.mxu3 %v68_v2  ;;  %v55_v8 = vld [vmem:[%s522_s0 + $0x20] sm:$0xff]  ;;  %24 = vst.msk [vmem:[#allocation2 + $0x28] sm:$0xff] %vm18_vm0, %v307_v3  ;;  %v62_v17 = vld [vmem:[%s522_s0 + $0x58] sm:$0xff] }
   0x7   :  { %134 = vmatpush.msra.mxu0 %v68_v2  ;;  %299 = vmatpush.msra.mxu1 %v68_v2  ;;  %25 = vst.msk [vmem:[#allocation2 + $0x30] sm:$0xff] %vm18_vm0, %v307_v3  ;;  %v66_v18 = vld [vmem:[%s522_s0 + $0x78] sm:$0xff]  ;;  %v425_v35 = vld [vmem:[%s523_s2] ss:$0 sm:$0xff] }
   0x8   :  { %303 = vmatpush.msra.mxu2 %v67_v4  ;;  %304 = vmatpush.msra.mxu3 %v67_v4  ;;  %26 = vst.msk [vmem:[#allocation2 + $0x38] sm:$0xff] %vm18_vm0, %v307_v3  ;;  %v54_v19 = vld [vmem:[%s522_s0 + $0x18] sm:$0xff]  ;;  %v35_v21 = vld [vmem:[#allocation2] sm:$0xff] }
   0x9   :  { %285 = vmatmul.msk.f32.vlgmr.msra.gmra.mxu2 %vm71_vm1, %v59_v5  ;;  %289 = vmatmul.msk.f32.vlgmr.msra.gmra.mxu3 %vm71_vm1, %v63_v6  ;;  %27 = vst.msk [vmem:[#allocation2 + $0x40] sm:$0xff] %vm18_vm0, %v307_v3  ;;  %v58_v20 = vld [vmem:[%s522_s0 + $0x38] sm:$0xff]  ;;  %v36_v33 = vld [vmem:[#allocation2 + $0x8] sm:$0xff] }
   0xa   :  { %135 = vmatpush.msra.mxu0 %v67_v4  ;;  %302 = vmatpush.msra.mxu1 %v67_v4  ;;  %28 = vst.msk [vmem:[#allocation2 + $0x48] sm:$0xff] %vm18_vm0, %v307_v3  ;;  %v37_v51 = vld [vmem:[#allocation2 + $0x10] sm:$0xff] }
   0xb   :  { %277 = vmatmul.msk.f32.vlgmr.msra.gmra.mxu0 %vm71_vm1, %v51_v7  ;;  %281 = vmatmul.msk.f32.vlgmr.msra.gmra.mxu1 %vm71_vm1, %v55_v8  ;;  %29 = vst.msk [vmem:[#allocation2 + $0x50] sm:$0xff] %vm18_vm0, %v307_v3  ;;  %v38_v7 = vld [vmem:[#allocation2 + $0x18] sm:$0xff] }
   0xc   :  { %30 = vst.msk [vmem:[#allocation2 + $0x58] sm:$0xff] %vm18_vm0, %v307_v3  ;;  %v39_v22 = vld [vmem:[#allocation2 + $0x20] sm:$0xff] }
   0xd   :  { %31 = vst.msk [vmem:[#allocation2 + $0x60] sm:$0xff] %vm18_vm0, %v307_v3  ;;  %v40_v34 = vld [vmem:[#allocation2 + $0x28] sm:$0xff] }
   0xe   :  { %32 = vst.msk [vmem:[#allocation2 + $0x68] sm:$0xff] %vm18_vm0, %v307_v3  ;;  %v41_v52 = vld [vmem:[#allocation2 + $0x30] sm:$0xff] }
   0xf   :  { %33 = vst.msk [vmem:[#allocation2 + $0x70] sm:$0xff] %vm18_vm0, %v307_v3  ;;  %v42_v8 = vld [vmem:[#allocation2 + $0x38] sm:$0xff] }
  0x10   :  { %34 = vst.msk [vmem:[#allocation2 + $0x78] sm:$0xff] %vm18_vm0, %v307_v3  ;;  %v43_v27 = vld [vmem:[#allocation2 + $0x40] sm:$0xff] }
  0x11   :  { %286 = vmatmul.msk.f32.gmra.mxu2 %vm71_vm1, %v60_v9  ;;  %290 = vmatmul.msk.f32.gmra.mxu3 %vm71_vm1, %v64_v10  ;;  %v44_v41 = vld [vmem:[#allocation2 + $0x48] sm:$0xff] }
  0x12   :  { %v45_v61 = vld [vmem:[#allocation2 + $0x50] sm:$0xff] }
  0x13   :  { %278 = vmatmul.msk.f32.gmra.mxu0 %vm71_vm1, %v52_v11  ;;  %282 = vmatmul.msk.f32.gmra.mxu1 %vm71_vm1, %v56_v12 }
  0x14   :  { %v47_v28 = vld [vmem:[#allocation2 + $0x60] sm:$0xff] }
  0x15   :  { %v48_v42 = vld [vmem:[#allocation2 + $0x68] sm:$0xff] }
  0x16   :  { %v49_v62 = vld [vmem:[#allocation2 + $0x70] sm:$0xff] }
  0x19   :  { %287 = vmatmul.msk.f32.gmra.mxu2 %vm71_vm1, %v61_v13  ;;  %291 = vmatmul.msk.f32.gmra.mxu3 %vm71_vm1, %v65_v14 }
  0x1b   :  { %279 = vmatmul.msk.f32.gmra.mxu0 %vm71_vm1, %v53_v15  ;;  %283 = vmatmul.msk.f32.gmra.mxu1 %vm71_vm1, %v57_v16 }
  0x21   :  { %288 = vmatmul.msk.f32.gmra.mxu2 %vm71_vm1, %v62_v17  ;;  %292 = vmatmul.msk.f32.gmra.mxu3 %vm71_vm1, %v66_v18  ;;  %v46_v17 = vld [vmem:[#allocation2 + $0x58] sm:$0xff] }
  0x22   :  { %v50_v18 = vld [vmem:[#allocation2 + $0x78] sm:$0xff] }
  0x23   :  { %280 = vmatmul.msk.f32.gmra.mxu0 %vm71_vm1, %v54_v19  ;;  %284 = vmatmul.msk.f32.gmra.mxu1 %vm71_vm1, %v58_v20 }
  0x88   :  { %v137_v23 = vpop.f32.mrf.mxu0  ;;  %v149_v24 = vpop.f32.mrf.mxu1 }
  0x89   :  { %v185_v25 = vadd.f32 %v137_v23, %v35_v21  ;;  %v189_v26 = vadd.f32 %v149_v24, %v39_v22 }
  0x8b   :  { %202 = vst.msk [vmem:[#allocation2] sm:$0xff] %vm18_vm0, %v185_v25 }
  0x8c   :  { %206 = vst.msk [vmem:[#allocation2 + $0x20] sm:$0xff] %vm18_vm0, %v189_v26  ;;  %v161_v29 = vpop.f32.mrf.mxu2  ;;  %v173_v30 = vpop.f32.mrf.mxu3 }
  0x8d   :  { %v193_v31 = vadd.f32 %v161_v29, %v43_v27  ;;  %v197_v32 = vadd.f32 %v173_v30, %v47_v28 }
  0x8f   :  { %210 = vst.msk [vmem:[#allocation2 + $0x40] sm:$0xff] %vm18_vm0, %v193_v31 }
  0x90   :  { %214 = vst.msk [vmem:[#allocation2 + $0x60] sm:$0xff] %vm18_vm0, %v197_v32  ;;  %v140_v36 = vpop.f32.mrf.mxu0  ;;  %v152_v37 = vpop.f32.mrf.mxu1 }
  0x91   :  { %v186_v38 = vadd.f32 %v140_v36, %v36_v33  ;;  %v190_v39 = vadd.f32 %v152_v37, %v40_v34 }
  0x92   :  { %v221_v40 = vld [vmem:[#allocation2] sm:$0xff] }
  0x93   :  { %v241_v43 = vadd.f32 %v425_v35, %v221_v40  ;;  %v225_v44 = vld [vmem:[#allocation2 + $0x20] sm:$0xff]  ;;  %203 = vst.msk [vmem:[#allocation2 + $0x8] sm:$0xff] %vm18_vm0, %v186_v38 }
  0x94   :  { %v245_v45 = vadd.f32 %v425_v35, %v225_v44  ;;  %207 = vst.msk [vmem:[#allocation2 + $0x28] sm:$0xff] %vm18_vm0, %v190_v39  ;;  %v164_v46 = vpop.f32.mrf.mxu2  ;;  %v176_v47 = vpop.f32.mrf.mxu3 }
  0x95   :  { %257 = vst.msk [vmem:[%s524_s3] sm:$0xff] %vm18_vm0, %v241_v43  ;;  %v194_v48 = vadd.f32 %v164_v46, %v44_v41  ;;  %v198_v49 = vadd.f32 %v176_v47, %v48_v42 }
  0x96   :  { %261 = vst.msk [vmem:[%s524_s3 + $0x20] sm:$0xff] %vm18_vm0, %v245_v45  ;;  %v229_v50 = vld [vmem:[#allocation2 + $0x40] sm:$0xff] }
  0x97   :  { %v249_v53 = vadd.f32 %v425_v35, %v229_v50  ;;  %v233_v54 = vld [vmem:[#allocation2 + $0x60] sm:$0xff]  ;;  %211 = vst.msk [vmem:[#allocation2 + $0x48] sm:$0xff] %vm18_vm0, %v194_v48 }
  0x98   :  { %v253_v55 = vadd.f32 %v425_v35, %v233_v54  ;;  %215 = vst.msk [vmem:[#allocation2 + $0x68] sm:$0xff] %vm18_vm0, %v198_v49  ;;  %v143_v56 = vpop.f32.mrf.mxu0  ;;  %v155_v57 = vpop.f32.mrf.mxu1 }
  0x99   :  { %265 = vst.msk [vmem:[%s524_s3 + $0x40] sm:$0xff] %vm18_vm0, %v249_v53  ;;  %v187_v58 = vadd.f32 %v143_v56, %v37_v51  ;;  %v191_v59 = vadd.f32 %v155_v57, %v41_v52 }
  0x9a   :  { %269 = vst.msk [vmem:[%s524_s3 + $0x60] sm:$0xff] %vm18_vm0, %v253_v55  ;;  %v222_v60 = vld [vmem:[#allocation2 + $0x8] sm:$0xff] }
  0x9b   :  { %v242_v63 = vadd.f32 %v425_v35, %v222_v60  ;;  %v226_v0 = vld [vmem:[#allocation2 + $0x28] sm:$0xff]  ;;  %204 = vst.msk [vmem:[#allocation2 + $0x10] sm:$0xff] %vm18_vm0, %v187_v58 }
  0x9c   :  { %v246_v1 = vadd.f32 %v425_v35, %v226_v0  ;;  %208 = vst.msk [vmem:[#allocation2 + $0x30] sm:$0xff] %vm18_vm0, %v191_v59  ;;  %v167_v2 = vpop.f32.mrf.mxu2  ;;  %v179_v3 = vpop.f32.mrf.mxu3 }
  0x9d   :  { %258 = vst.msk [vmem:[%s524_s3 + $0x8] sm:$0xff] %vm18_vm0, %v242_v63  ;;  %v195_v4 = vadd.f32 %v167_v2, %v45_v61  ;;  %v199_v5 = vadd.f32 %v179_v3, %v49_v62 }
  0x9e   :  { %262 = vst.msk [vmem:[%s524_s3 + $0x28] sm:$0xff] %vm18_vm0, %v246_v1  ;;  %v230_v6 = vld [vmem:[#allocation2 + $0x48] sm:$0xff] }
  0x9f   :  { %v250_v9 = vadd.f32 %v425_v35, %v230_v6  ;;  %v234_v10 = vld [vmem:[#allocation2 + $0x68] sm:$0xff]  ;;  %212 = vst.msk [vmem:[#allocation2 + $0x50] sm:$0xff] %vm18_vm0, %v195_v4 }
  0xa0   :  { %v254_v11 = vadd.f32 %v425_v35, %v234_v10  ;;  %216 = vst.msk [vmem:[#allocation2 + $0x70] sm:$0xff] %vm18_vm0, %v199_v5  ;;  %v146_v12 = vpop.f32.mrf.mxu0  ;;  %v158_v13 = vpop.f32.mrf.mxu1 }
  0xa1   :  { %266 = vst.msk [vmem:[%s524_s3 + $0x48] sm:$0xff] %vm18_vm0, %v250_v9  ;;  %v188_v14 = vadd.f32 %v146_v12, %v38_v7  ;;  %v192_v15 = vadd.f32 %v158_v13, %v42_v8 }
  0xa2   :  { %270 = vst.msk [vmem:[%s524_s3 + $0x68] sm:$0xff] %vm18_vm0, %v254_v11  ;;  %v223_v16 = vld [vmem:[#allocation2 + $0x10] sm:$0xff] }
  0xa3   :  { %v243_v19 = vadd.f32 %v425_v35, %v223_v16  ;;  %v227_v20 = vld [vmem:[#allocation2 + $0x30] sm:$0xff]  ;;  %205 = vst.msk [vmem:[#allocation2 + $0x18] sm:$0xff] %vm18_vm0, %v188_v14 }
  0xa4   :  { %v247_v21 = vadd.f32 %v425_v35, %v227_v20  ;;  %209 = vst.msk [vmem:[#allocation2 + $0x38] sm:$0xff] %vm18_vm0, %v192_v15  ;;  %v170_v22 = vpop.f32.mrf.mxu2  ;;  %v182_v23 = vpop.f32.mrf.mxu3 }
  0xa5   :  { %259 = vst.msk [vmem:[%s524_s3 + $0x10] sm:$0xff] %vm18_vm0, %v243_v19  ;;  %v196_v24 = vadd.f32 %v170_v22, %v46_v17  ;;  %v200_v25 = vadd.f32 %v182_v23, %v50_v18 }
  0xa6   :  { %263 = vst.msk [vmem:[%s524_s3 + $0x30] sm:$0xff] %vm18_vm0, %v247_v21  ;;  %v231_v26 = vld [vmem:[#allocation2 + $0x50] sm:$0xff] }
  0xa7   :  { %v251_v27 = vadd.f32 %v425_v35, %v231_v26  ;;  %v235_v28 = vld [vmem:[#allocation2 + $0x70] sm:$0xff]  ;;  %213 = vst.msk [vmem:[#allocation2 + $0x58] sm:$0xff] %vm18_vm0, %v196_v24 }
  0xa8   :  { %v255_v29 = vadd.f32 %v425_v35, %v235_v28  ;;  %217 = vst.msk [vmem:[#allocation2 + $0x78] sm:$0xff] %vm18_vm0, %v200_v25 }
  0xa9   :  { %267 = vst.msk [vmem:[%s524_s3 + $0x50] sm:$0xff] %vm18_vm0, %v251_v27 }
  0xaa   :  { %271 = vst.msk [vmem:[%s524_s3 + $0x70] sm:$0xff] %vm18_vm0, %v255_v29  ;;  %v224_v30 = vld [vmem:[#allocation2 + $0x18] sm:$0xff] }
  0xab   :  { %v244_v31 = vadd.f32 %v425_v35, %v224_v30  ;;  %v228_v32 = vld [vmem:[#allocation2 + $0x38] sm:$0xff] }
  0xac   :  { %v248_v33 = vadd.f32 %v425_v35, %v228_v32 }
  0xad   :  { %260 = vst.msk [vmem:[%s524_s3 + $0x18] sm:$0xff] %vm18_vm0, %v244_v31 }
  0xae   :  { %264 = vst.msk [vmem:[%s524_s3 + $0x38] sm:$0xff] %vm18_vm0, %v248_v33  ;;  %v232_v34 = vld [vmem:[#allocation2 + $0x58] sm:$0xff] }
  0xaf   :  { %v252_v36 = vadd.f32 %v425_v35, %v232_v34  ;;  %v236_v37 = vld [vmem:[#allocation2 + $0x78] sm:$0xff] }
  0xb0   :  { %v256_v38 = vadd.f32 %v425_v35, %v236_v37 }
  0xb1   :  { %268 = vst.msk [vmem:[%s524_s3 + $0x58] sm:$0xff] %vm18_vm0, %v252_v36 }
  0xb2   :  { %272 = vst.msk [vmem:[%s524_s3 + $0x78] sm:$0xff] %vm18_vm0, %v256_v38 }

</bundles_post_ra>
